<compile_context>
chip_gen: v5e
topology: v5e:2x2
jax: 0.10.0
libtpu: 0.0.40
codegen_flags: <defaults>
</compile_context>

<pallas_src>
import functools

import jax
import jax.numpy as jnp
import numpy as np
from jax.experimental import pallas as pl
from jax.experimental.pallas import tpu as pltpu


# ----------------------------------------------------------------------------
# Pallas kernel: entire sequence in one invocation.
# ----------------------------------------------------------------------------
def lstm_seq_kernel(
    x_ref,       # (T*Bp, E)   time-major embedded inputs (batch sublane-padded)
    w_ih_ref,    # (E, 4H)
    w_hh_ref,    # (H, 4H)
    b_ref,       # (1, 4H)     b_ih + b_hh
    w_d_ref,     # (H, Vp)     dense weight, zero-padded to Vp lanes
    b_d_ref,     # (1, Vp)     dense bias, zero-padded
    h0_ref,      # (Bp, H)
    c0_ref,      # (Bp, H)
    logits_ref,  # (T*Bp, Vp)  lane-dense output
    h_out_ref,   # (Bp, H)     final hidden state
    c_out_ref,   # (Bp, H)     final cell state
    xw_sc,       # VMEM scratch (T*Bp, 4H): precomputed input projection
    h_all_sc,    # VMEM scratch (T*Bp, H):  collected hidden states
    *,
    seq_len: int,
    batch_p: int,
    hidden: int,
):
    # ---- batched input projection for all timesteps (one MXU matmul),
    #      stored to VMEM so the recurrence loop's live set stays small -------
    xw_sc[...] = (
        jnp.dot(x_ref[...], w_ih_ref[...], preferred_element_type=jnp.float32)
        + b_ref[...]
    )                                                   # (T*Bp, 4H)

    w_hh = w_hh_ref[...]                                # loop-invariant, held in vregs

    # Lane mask selecting the "g" gate (tanh) lanes; PyTorch gate order i,f,g,o.
    lane = jax.lax.broadcasted_iota(jnp.int32, (batch_p, 4 * hidden), 1)
    g_lanes = (lane >= 2 * hidden) & (lane < 3 * hidden)

    # ---- recurrence: only h @ W_hh is on the serial critical path ------------
    def step(t, carry):
        h, c = carry
        off = pl.multiple_of(t * batch_p, 8)            # aligned sublane offset
        gates = xw_sc[pl.ds(off, batch_p), :] + jnp.dot(
            h, w_hh, preferred_element_type=jnp.float32
        )                                               # (Bp, 4H) full-sublane tile
        # Single EUP transcendental per step: tanh(x) = 2*sigmoid(2x) - 1.
        pre = jnp.where(g_lanes, gates + gates, gates)
        s = jax.nn.sigmoid(pre)
        act = jnp.where(g_lanes, s + s - 1.0, s)
        i_g = act[:, 0 * hidden:1 * hidden]
        f_g = act[:, 1 * hidden:2 * hidden]
        g_g = act[:, 2 * hidden:3 * hidden]
        o_g = act[:, 3 * hidden:4 * hidden]
        c_new = f_g * c + i_g * g_g
        h_new = o_g * jnp.tanh(c_new)
        h_all_sc[pl.ds(off, batch_p), :] = h_new        # full-sublane store
        return (h_new, c_new)

    h, c = jax.lax.fori_loop(
        0, seq_len, step, (h0_ref[...], c0_ref[...]), unroll=True
    )

    # ---- batched dense projection over all timesteps (one MXU matmul) -------
    logits_ref[...] = (
        jnp.dot(h_all_sc[...], w_d_ref[...], preferred_element_type=jnp.float32)
        + b_d_ref[...]
    )
    h_out_ref[...] = h
    c_out_ref[...] = c


# ----------------------------------------------------------------------------
# Wrapper: embedding gather (glue) + single fused pallas_call.
# ----------------------------------------------------------------------------
def lstmnet_forward(tokens, params, prev_state):
    """tokens: (B, T) int32.  Returns (logits (B, T, V), (h (B, H), c (B, H)))."""
    emb_tbl, w_ih, w_hh, b, w_d, b_d = params
    h0, c0 = prev_state

    B, T = tokens.shape
    E = emb_tbl.shape[1]
    H = h0.shape[1]
    V = w_d.shape[1]
    Vp = max(128, ((V + 127) // 128) * 128)             # lane-dense logits width
    Bp = max(8, ((B + 7) // 8) * 8)                     # sublane-filled batch

    # Zero-pad the dense projection so in-kernel logit stores are unmasked.
    w_d_p = jnp.pad(w_d, ((0, 0), (0, Vp - V)))
    b_d_p = jnp.pad(b_d, ((0, 0), (0, Vp - V)))

    # Pad the batch to a sublane multiple; padded rows run a harmless LSTM over
    # token 0 and are sliced off below.
    tokens_p = jnp.pad(tokens, ((0, Bp - B), (0, 0)))
    h0_p = jnp.pad(h0, ((0, Bp - B), (0, 0)))
    c0_p = jnp.pad(c0, ((0, Bp - B), (0, 0)))

    # Embedding lookup (glue), gathered directly in time-major order so no
    # (B, T, E) HBM transpose is emitted.
    flat_tokens = tokens_p.T.reshape(-1)                # (T*Bp,), time-major
    x_all = jnp.take(emb_tbl, flat_tokens, axis=0)      # (T*Bp, E)

    kernel = functools.partial(lstm_seq_kernel, seq_len=T, batch_p=Bp, hidden=H)

    logits_flat, h_out, c_out = pl.pallas_call(
        kernel,
        out_shape=(
            jax.ShapeDtypeStruct((T * Bp, Vp), jnp.float32),
            jax.ShapeDtypeStruct((Bp, H), jnp.float32),
            jax.ShapeDtypeStruct((Bp, H), jnp.float32),
        ),
        scratch_shapes=[
            pltpu.VMEM((T * Bp, 4 * H), jnp.float32),   # precomputed xw
            pltpu.VMEM((T * Bp, H), jnp.float32),       # collected hidden states
        ],
    )(x_all, w_ih, w_hh, b, w_d_p, b_d_p, h0_p, c0_p)

    # Drop lane/batch padding, restore batch_first (tiny at these test shapes;
    # at production keep consumers time-major or fold into an out_spec).
    logits = logits_flat.reshape(T, Bp, Vp)[:, :B, :V].transpose(1, 0, 2)
    return logits, (h_out[:B], c_out[:B])


# ----------------------------------------------------------------------------
# Pure-JAX reference (mirrors torch.nn.LSTM semantics, gate order i,f,g,o).
# ----------------------------------------------------------------------------
def lstmnet_reference(tokens, params, prev_state):
    emb_tbl, w_ih, w_hh, b, w_d, b_d = params
    h0, c0 = prev_state
    H = h0.shape[1]

    x = jnp.take(emb_tbl, tokens, axis=0)               # (B, T, E)
    x_tbe = jnp.transpose(x, (1, 0, 2))                 # (T, B, E)

    def step(carry, xt):
        h, c = carry
        gates = xt @ w_ih + h @ w_hh + b[0]
        i_g = jax.nn.sigmoid(gates[:, 0 * H:1 * H])
        f_g = jax.nn.sigmoid(gates[:, 1 * H:2 * H])
        g_g = jnp.tanh(gates[:, 2 * H:3 * H])
        o_g = jax.nn.sigmoid(gates[:, 3 * H:4 * H])
        c_new = f_g * c + i_g * g_g
        h_new = o_g * jnp.tanh(c_new)
        return (h_new, c_new), h_new

    (h_f, c_f), hs = jax.lax.scan(step, (h0, c0), x_tbe)
    logits_tbv = jnp.einsum("tbh,hv->tbv", hs, w_d) + b_d[0]
    return jnp.transpose(logits_tbv, (1, 0, 2)), (h_f, c_f)


# ----------------------------------------------------------------------------
# Main
# ----------------------------------------------------------------------------
if __name__ == "__main__":
    # Small shapes consistent with the module (scaled-down seq / hidden).
    N_VOCAB = 36
    EMBED = 36
    HIDDEN = 32
    BATCH = 2
    SEQ = 8

    key = jax.random.PRNGKey(0)
    keys = jax.random.split(key, 8)

    scale = 1.0 / np.sqrt(HIDDEN)
    emb_tbl = jax.random.normal(keys[0], (N_VOCAB, EMBED), jnp.float32)
    # Stored pre-transposed for right-multiplication: x @ W_ih, h @ W_hh.
    w_ih = jax.random.uniform(keys[1], (EMBED, 4 * HIDDEN), jnp.float32, -scale, scale)
    w_hh = jax.random.uniform(keys[2], (HIDDEN, 4 * HIDDEN), jnp.float32, -scale, scale)
    b_ih = jax.random.uniform(keys[3], (4 * HIDDEN,), jnp.float32, -scale, scale)
    b_hh = jax.random.uniform(keys[4], (4 * HIDDEN,), jnp.float32, -scale, scale)
    b = (b_ih + b_hh)[None, :]                          # (1, 4H)
    w_d = jax.random.uniform(keys[5], (HIDDEN, N_VOCAB), jnp.float32, -scale, scale)
    b_d = jax.random.uniform(keys[6], (N_VOCAB,), jnp.float32, -scale, scale)[None, :]

    params = (emb_tbl, w_ih, w_hh, b, w_d, b_d)

    tokens = jax.random.randint(keys[7], (BATCH, SEQ), 0, N_VOCAB, jnp.int32)
    h0 = jnp.zeros((BATCH, HIDDEN), jnp.float32)        # zero_state
    c0 = jnp.zeros((BATCH, HIDDEN), jnp.float32)

    logits, (h_out, c_out) = jax.jit(lstmnet_forward)(tokens, params, (h0, c0))
    jax.block_until_ready((logits, h_out, c_out))

    ref_logits, (ref_h, ref_c) = lstmnet_reference(tokens, params, (h0, c0))
    np.testing.assert_allclose(np.asarray(logits), np.asarray(ref_logits), atol=1e-5, rtol=1e-5)
    np.testing.assert_allclose(np.asarray(h_out), np.asarray(ref_h), atol=1e-5, rtol=1e-5)
    np.testing.assert_allclose(np.asarray(c_out), np.asarray(ref_c), atol=1e-5, rtol=1e-5)

    print("KERNEL_OK")
</pallas_src>

<mosaic_0001>
module attributes {stable_mosaic.version = 11 : i64} {
  func.func @lstm_seq_kernel(%arg0: memref<64x36xf32, #tpu.memory_space<vmem>>, %arg1: memref<36x128xf32, #tpu.memory_space<vmem>>, %arg2: memref<32x128xf32, #tpu.memory_space<vmem>>, %arg3: memref<1x128xf32, #tpu.memory_space<vmem>>, %arg4: memref<32x128xf32, #tpu.memory_space<vmem>>, %arg5: memref<1x128xf32, #tpu.memory_space<vmem>>, %arg6: memref<8x32xf32, #tpu.memory_space<vmem>>, %arg7: memref<8x32xf32, #tpu.memory_space<vmem>>, %arg8: memref<64x128xf32, #tpu.memory_space<vmem>>, %arg9: memref<8x32xf32, #tpu.memory_space<vmem>>, %arg10: memref<8x32xf32, #tpu.memory_space<vmem>>, %arg11: memref<64x128xf32, #tpu.memory_space<vmem>>, %arg12: memref<64x32xf32, #tpu.memory_space<vmem>>) attributes {dimension_semantics = [], scalar_prefetch = 0 : i64, scratch_operands = 2 : i64, tpu.core_type = #tpu.core_type<tc>} {
    %c0 = arith.constant 0 : index
    %c0_0 = arith.constant 0 : index
    %0 = vector.load %arg0[%c0, %c0_0] : memref<64x36xf32, #tpu.memory_space<vmem>>, vector<64x36xf32>
    %c0_1 = arith.constant 0 : index
    %c0_2 = arith.constant 0 : index
    %1 = vector.load %arg1[%c0_1, %c0_2] : memref<36x128xf32, #tpu.memory_space<vmem>>, vector<36x128xf32>
    %cst = arith.constant dense<0.000000e+00> : vector<64x128xf32>
    %2 = tpu.matmul %0, %1, %cst {dimension_numbers = #tpu.dot_dimension_numbers<[1], [0], [0], [1], [0, 0, 1, 1], [], []>} : vector<64x36xf32>, vector<36x128xf32>, vector<64x128xf32> -> vector<64x128xf32>
    %c0_3 = arith.constant 0 : index
    %c0_4 = arith.constant 0 : index
    %3 = vector.load %arg3[%c0_3, %c0_4] : memref<1x128xf32, #tpu.memory_space<vmem>>, vector<1x128xf32>
    %4 = vector.broadcast %3 : vector<1x128xf32> to vector<64x128xf32>
    %5 = arith.addf %2, %4 : vector<64x128xf32>
    %c0_5 = arith.constant 0 : index
    %c0_6 = arith.constant 0 : index
    %6 = vector.load %arg11[%c0_5, %c0_6] : memref<64x128xf32, #tpu.memory_space<vmem>>, vector<64x128xf32>
    tpu.vector_store %arg11[%c0_5, %c0_6], %5 {strides = array<i32>} : memref<64x128xf32, #tpu.memory_space<vmem>>, vector<64x128xf32>,
    %c0_7 = arith.constant 0 : index
    %c0_8 = arith.constant 0 : index
    %7 = vector.load %arg2[%c0_7, %c0_8] : memref<32x128xf32, #tpu.memory_space<vmem>>, vector<32x128xf32>
    %8 = tpu.iota {dimensions = array<i32: 1>} : vector<8x128xi32>
    %c64_i32 = arith.constant 64 : i32
    %9 = vector.broadcast %c64_i32 : i32 to vector<8x128xi32>
    %10 = arith.cmpi sge, %8, %9 : vector<8x128xi32>
    %c96_i32 = arith.constant 96 : i32
    %11 = vector.broadcast %c96_i32 : i32 to vector<8x128xi32>
    %12 = arith.cmpi slt, %8, %11 : vector<8x128xi32>
    %13 = arith.andi %10, %12 : vector<8x128xi1>
    %c0_9 = arith.constant 0 : index
    %c0_10 = arith.constant 0 : index
    %14 = vector.load %arg6[%c0_9, %c0_10] : memref<8x32xf32, #tpu.memory_space<vmem>>, vector<8x32xf32>
    %c0_11 = arith.constant 0 : index
    %c0_12 = arith.constant 0 : index
    %15 = vector.load %arg7[%c0_11, %c0_12] : memref<8x32xf32, #tpu.memory_space<vmem>>, vector<8x32xf32>
    %c0_i32 = arith.constant 0 : i32
    %c8_i32 = arith.constant 8 : i32
    %16 = arith.muli %c0_i32, %c8_i32 : i32
    %17 = tpu.assume_multiple %16, 8 : i32
    %18 = arith.index_cast %17 : i32 to index
    %c0_13 = arith.constant 0 : index
    %19 = vector.load %arg11[%18, %c0_13] : memref<64x128xf32, #tpu.memory_space<vmem>>, vector<8x128xf32>
    %cst_14 = arith.constant dense<0.000000e+00> : vector<8x128xf32>
    %20 = tpu.matmul %14, %7, %cst_14 {dimension_numbers = #tpu.dot_dimension_numbers<[1], [0], [0], [1], [0, 0, 1, 1], [], []>} : vector<8x32xf32>, vector<32x128xf32>, vector<8x128xf32> -> vector<8x128xf32>
    %21 = arith.addf %19, %20 : vector<8x128xf32>
    %22 = arith.addf %21, %21 : vector<8x128xf32>
    %23 = arith.select %13, %22, %21 : vector<8x128xi1>, vector<8x128xf32>
    %24 = arith.negf %23 : vector<8x128xf32>
    %25 = math.exp %24 : vector<8x128xf32>
    %cst_15 = arith.constant 1.000000e+00 : f32
    %26 = vector.broadcast %cst_15 : f32 to vector<8x128xf32>
    %27 = arith.addf %26, %25 : vector<8x128xf32>
    %28 = arith.divf %26, %27 : vector<8x128xf32>
    %29 = arith.addf %28, %28 : vector<8x128xf32>
    %cst_16 = arith.constant 1.000000e+00 : f32
    %30 = vector.broadcast %cst_16 : f32 to vector<8x128xf32>
    %31 = arith.subf %29, %30 : vector<8x128xf32>
    %32 = arith.select %13, %31, %28 : vector<8x128xi1>, vector<8x128xf32>
    %33 = vector.extract_strided_slice %32 {offsets = [0, 0], sizes = [8, 32], strides = [1, 1]} : vector<8x128xf32> to vector<8x32xf32>
    %34 = vector.extract_strided_slice %32 {offsets = [0, 32], sizes = [8, 32], strides = [1, 1]} : vector<8x128xf32> to vector<8x32xf32>
    %35 = vector.extract_strided_slice %32 {offsets = [0, 64], sizes = [8, 32], strides = [1, 1]} : vector<8x128xf32> to vector<8x32xf32>
    %36 = vector.extract_strided_slice %32 {offsets = [0, 96], sizes = [8, 32], strides = [1, 1]} : vector<8x128xf32> to vector<8x32xf32>
    %37 = arith.mulf %34, %15 : vector<8x32xf32>
    %38 = arith.mulf %33, %35 : vector<8x32xf32>
    %39 = arith.addf %37, %38 : vector<8x32xf32>
    %40 = math.tanh %39 : vector<8x32xf32>
    %41 = arith.mulf %36, %40 : vector<8x32xf32>
    %42 = arith.index_cast %17 : i32 to index
    %c0_17 = arith.constant 0 : index
    %43 = vector.load %arg12[%42, %c0_17] : memref<64x32xf32, #tpu.memory_space<vmem>>, vector<8x32xf32>
    tpu.vector_store %arg12[%42, %c0_17], %41 {strides = array<i32>} : memref<64x32xf32, #tpu.memory_space<vmem>>, vector<8x32xf32>,
    %c1_i32 = arith.constant 1 : i32
    %c8_i32_18 = arith.constant 8 : i32
    %44 = arith.muli %c1_i32, %c8_i32_18 : i32
    %45 = tpu.assume_multiple %44, 8 : i32
    %46 = arith.index_cast %45 : i32 to index
    %c0_19 = arith.constant 0 : index
    %47 = vector.load %arg11[%46, %c0_19] : memref<64x128xf32, #tpu.memory_space<vmem>>, vector<8x128xf32>
    %cst_20 = arith.constant dense<0.000000e+00> : vector<8x128xf32>
    %48 = tpu.matmul %41, %7, %cst_20 {dimension_numbers = #tpu.dot_dimension_numbers<[1], [0], [0], [1], [0, 0, 1, 1], [], []>} : vector<8x32xf32>, vector<32x128xf32>, vector<8x128xf32> -> vector<8x128xf32>
    %49 = arith.addf %47, %48 : vector<8x128xf32>
    %50 = arith.addf %49, %49 : vector<8x128xf32>
    %51 = arith.select %13, %50, %49 : vector<8x128xi1>, vector<8x128xf32>
    %52 = arith.negf %51 : vector<8x128xf32>
    %53 = math.exp %52 : vector<8x128xf32>
    %cst_21 = arith.constant 1.000000e+00 : f32
    %54 = vector.broadcast %cst_21 : f32 to vector<8x128xf32>
    %55 = arith.addf %54, %53 : vector<8x128xf32>
    %56 = arith.divf %54, %55 : vector<8x128xf32>
    %57 = arith.addf %56, %56 : vector<8x128xf32>
    %cst_22 = arith.constant 1.000000e+00 : f32
    %58 = vector.broadcast %cst_22 : f32 to vector<8x128xf32>
    %59 = arith.subf %57, %58 : vector<8x128xf32>
    %60 = arith.select %13, %59, %56 : vector<8x128xi1>, vector<8x128xf32>
    %61 = vector.extract_strided_slice %60 {offsets = [0, 0], sizes = [8, 32], strides = [1, 1]} : vector<8x128xf32> to vector<8x32xf32>
    %62 = vector.extract_strided_slice %60 {offsets = [0, 32], sizes = [8, 32], strides = [1, 1]} : vector<8x128xf32> to vector<8x32xf32>
    %63 = vector.extract_strided_slice %60 {offsets = [0, 64], sizes = [8, 32], strides = [1, 1]} : vector<8x128xf32> to vector<8x32xf32>
    %64 = vector.extract_strided_slice %60 {offsets = [0, 96], sizes = [8, 32], strides = [1, 1]} : vector<8x128xf32> to vector<8x32xf32>
    %65 = arith.mulf %62, %39 : vector<8x32xf32>
    %66 = arith.mulf %61, %63 : vector<8x32xf32>
    %67 = arith.addf %65, %66 : vector<8x32xf32>
    %68 = math.tanh %67 : vector<8x32xf32>
    %69 = arith.mulf %64, %68 : vector<8x32xf32>
    %70 = arith.index_cast %45 : i32 to index
    %c0_23 = arith.constant 0 : index
    %71 = vector.load %arg12[%70, %c0_23] : memref<64x32xf32, #tpu.memory_space<vmem>>, vector<8x32xf32>
    tpu.vector_store %arg12[%70, %c0_23], %69 {strides = array<i32>} : memref<64x32xf32, #tpu.memory_space<vmem>>, vector<8x32xf32>,
    %c2_i32 = arith.constant 2 : i32
    %c8_i32_24 = arith.constant 8 : i32
    %72 = arith.muli %c2_i32, %c8_i32_24 : i32
    %73 = tpu.assume_multiple %72, 8 : i32
    %74 = arith.index_cast %73 : i32 to index
    %c0_25 = arith.constant 0 : index
    %75 = vector.load %arg11[%74, %c0_25] : memref<64x128xf32, #tpu.memory_space<vmem>>, vector<8x128xf32>
    %cst_26 = arith.constant dense<0.000000e+00> : vector<8x128xf32>
    %76 = tpu.matmul %69, %7, %cst_26 {dimension_numbers = #tpu.dot_dimension_numbers<[1], [0], [0], [1], [0, 0, 1, 1], [], []>} : vector<8x32xf32>, vector<32x128xf32>, vector<8x128xf32> -> vector<8x128xf32>
    %77 = arith.addf %75, %76 : vector<8x128xf32>
    %78 = arith.addf %77, %77 : vector<8x128xf32>
    %79 = arith.select %13, %78, %77 : vector<8x128xi1>, vector<8x128xf32>
    %80 = arith.negf %79 : vector<8x128xf32>
    %81 = math.exp %80 : vector<8x128xf32>
    %cst_27 = arith.constant 1.000000e+00 : f32
    %82 = vector.broadcast %cst_27 : f32 to vector<8x128xf32>
    %83 = arith.addf %82, %81 : vector<8x128xf32>
    %84 = arith.divf %82, %83 : vector<8x128xf32>
    %85 = arith.addf %84, %84 : vector<8x128xf32>
    %cst_28 = arith.constant 1.000000e+00 : f32
    %86 = vector.broadcast %cst_28 : f32 to vector<8x128xf32>
    %87 = arith.subf %85, %86 : vector<8x128xf32>
    %88 = arith.select %13, %87, %84 : vector<8x128xi1>, vector<8x128xf32>
    %89 = vector.extract_strided_slice %88 {offsets = [0, 0], sizes = [8, 32], strides = [1, 1]} : vector<8x128xf32> to vector<8x32xf32>
    %90 = vector.extract_strided_slice %88 {offsets = [0, 32], sizes = [8, 32], strides = [1, 1]} : vector<8x128xf32> to vector<8x32xf32>
    %91 = vector.extract_strided_slice %88 {offsets = [0, 64], sizes = [8, 32], strides = [1, 1]} : vector<8x128xf32> to vector<8x32xf32>
    %92 = vector.extract_strided_slice %88 {offsets = [0, 96], sizes = [8, 32], strides = [1, 1]} : vector<8x128xf32> to vector<8x32xf32>
    %93 = arith.mulf %90, %67 : vector<8x32xf32>
    %94 = arith.mulf %89, %91 : vector<8x32xf32>
    %95 = arith.addf %93, %94 : vector<8x32xf32>
    %96 = math.tanh %95 : vector<8x32xf32>
    %97 = arith.mulf %92, %96 : vector<8x32xf32>
    %98 = arith.index_cast %73 : i32 to index
    %c0_29 = arith.constant 0 : index
    %99 = vector.load %arg12[%98, %c0_29] : memref<64x32xf32, #tpu.memory_space<vmem>>, vector<8x32xf32>
    tpu.vector_store %arg12[%98, %c0_29], %97 {strides = array<i32>} : memref<64x32xf32, #tpu.memory_space<vmem>>, vector<8x32xf32>,
    %c3_i32 = arith.constant 3 : i32
    %c8_i32_30 = arith.constant 8 : i32
    %100 = arith.muli %c3_i32, %c8_i32_30 : i32
    %101 = tpu.assume_multiple %100, 8 : i32
    %102 = arith.index_cast %101 : i32 to index
    %c0_31 = arith.constant 0 : index
    %103 = vector.load %arg11[%102, %c0_31] : memref<64x128xf32, #tpu.memory_space<vmem>>, vector<8x128xf32>
    %cst_32 = arith.constant dense<0.000000e+00> : vector<8x128xf32>
    %104 = tpu.matmul %97, %7, %cst_32 {dimension_numbers = #tpu.dot_dimension_numbers<[1], [0], [0], [1], [0, 0, 1, 1], [], []>} : vector<8x32xf32>, vector<32x128xf32>, vector<8x128xf32> -> vector<8x128xf32>
    %105 = arith.addf %103, %104 : vector<8x128xf32>
    %106 = arith.addf %105, %105 : vector<8x128xf32>
    %107 = arith.select %13, %106, %105 : vector<8x128xi1>, vector<8x128xf32>
    %108 = arith.negf %107 : vector<8x128xf32>
    %109 = math.exp %108 : vector<8x128xf32>
    %cst_33 = arith.constant 1.000000e+00 : f32
    %110 = vector.broadcast %cst_33 : f32 to vector<8x128xf32>
    %111 = arith.addf %110, %109 : vector<8x128xf32>
    %112 = arith.divf %110, %111 : vector<8x128xf32>
    %113 = arith.addf %112, %112 : vector<8x128xf32>
    %cst_34 = arith.constant 1.000000e+00 : f32
    %114 = vector.broadcast %cst_34 : f32 to vector<8x128xf32>
    %115 = arith.subf %113, %114 : vector<8x128xf32>
    %116 = arith.select %13, %115, %112 : vector<8x128xi1>, vector<8x128xf32>
    %117 = vector.extract_strided_slice %116 {offsets = [0, 0], sizes = [8, 32], strides = [1, 1]} : vector<8x128xf32> to vector<8x32xf32>
    %118 = vector.extract_strided_slice %116 {offsets = [0, 32], sizes = [8, 32], strides = [1, 1]} : vector<8x128xf32> to vector<8x32xf32>
    %119 = vector.extract_strided_slice %116 {offsets = [0, 64], sizes = [8, 32], strides = [1, 1]} : vector<8x128xf32> to vector<8x32xf32>
    %120 = vector.extract_strided_slice %116 {offsets = [0, 96], sizes = [8, 32], strides = [1, 1]} : vector<8x128xf32> to vector<8x32xf32>
    %121 = arith.mulf %118, %95 : vector<8x32xf32>
    %122 = arith.mulf %117, %119 : vector<8x32xf32>
    %123 = arith.addf %121, %122 : vector<8x32xf32>
    %124 = math.tanh %123 : vector<8x32xf32>
    %125 = arith.mulf %120, %124 : vector<8x32xf32>
    %126 = arith.index_cast %101 : i32 to index
    %c0_35 = arith.constant 0 : index
    %127 = vector.load %arg12[%126, %c0_35] : memref<64x32xf32, #tpu.memory_space<vmem>>, vector<8x32xf32>
    tpu.vector_store %arg12[%126, %c0_35], %125 {strides = array<i32>} : memref<64x32xf32, #tpu.memory_space<vmem>>, vector<8x32xf32>,
    %c4_i32 = arith.constant 4 : i32
    %c8_i32_36 = arith.constant 8 : i32
    %128 = arith.muli %c4_i32, %c8_i32_36 : i32
    %129 = tpu.assume_multiple %128, 8 : i32
    %130 = arith.index_cast %129 : i32 to index
    %c0_37 = arith.constant 0 : index
    %131 = vector.load %arg11[%130, %c0_37] : memref<64x128xf32, #tpu.memory_space<vmem>>, vector<8x128xf32>
    %cst_38 = arith.constant dense<0.000000e+00> : vector<8x128xf32>
    %132 = tpu.matmul %125, %7, %cst_38 {dimension_numbers = #tpu.dot_dimension_numbers<[1], [0], [0], [1], [0, 0, 1, 1], [], []>} : vector<8x32xf32>, vector<32x128xf32>, vector<8x128xf32> -> vector<8x128xf32>
    %133 = arith.addf %131, %132 : vector<8x128xf32>
    %134 = arith.addf %133, %133 : vector<8x128xf32>
    %135 = arith.select %13, %134, %133 : vector<8x128xi1>, vector<8x128xf32>
    %136 = arith.negf %135 : vector<8x128xf32>
    %137 = math.exp %136 : vector<8x128xf32>
    %cst_39 = arith.constant 1.000000e+00 : f32
    %138 = vector.broadcast %cst_39 : f32 to vector<8x128xf32>
    %139 = arith.addf %138, %137 : vector<8x128xf32>
    %140 = arith.divf %138, %139 : vector<8x128xf32>
    %141 = arith.addf %140, %140 : vector<8x128xf32>
    %cst_40 = arith.constant 1.000000e+00 : f32
    %142 = vector.broadcast %cst_40 : f32 to vector<8x128xf32>
    %143 = arith.subf %141, %142 : vector<8x128xf32>
    %144 = arith.select %13, %143, %140 : vector<8x128xi1>, vector<8x128xf32>
    %145 = vector.extract_strided_slice %144 {offsets = [0, 0], sizes = [8, 32], strides = [1, 1]} : vector<8x128xf32> to vector<8x32xf32>
    %146 = vector.extract_strided_slice %144 {offsets = [0, 32], sizes = [8, 32], strides = [1, 1]} : vector<8x128xf32> to vector<8x32xf32>
    %147 = vector.extract_strided_slice %144 {offsets = [0, 64], sizes = [8, 32], strides = [1, 1]} : vector<8x128xf32> to vector<8x32xf32>
    %148 = vector.extract_strided_slice %144 {offsets = [0, 96], sizes = [8, 32], strides = [1, 1]} : vector<8x128xf32> to vector<8x32xf32>
    %149 = arith.mulf %146, %123 : vector<8x32xf32>
    %150 = arith.mulf %145, %147 : vector<8x32xf32>
    %151 = arith.addf %149, %150 : vector<8x32xf32>
    %152 = math.tanh %151 : vector<8x32xf32>
    %153 = arith.mulf %148, %152 : vector<8x32xf32>
    %154 = arith.index_cast %129 : i32 to index
    %c0_41 = arith.constant 0 : index
    %155 = vector.load %arg12[%154, %c0_41] : memref<64x32xf32, #tpu.memory_space<vmem>>, vector<8x32xf32>
    tpu.vector_store %arg12[%154, %c0_41], %153 {strides = array<i32>} : memref<64x32xf32, #tpu.memory_space<vmem>>, vector<8x32xf32>,
    %c5_i32 = arith.constant 5 : i32
    %c8_i32_42 = arith.constant 8 : i32
    %156 = arith.muli %c5_i32, %c8_i32_42 : i32
    %157 = tpu.assume_multiple %156, 8 : i32
    %158 = arith.index_cast %157 : i32 to index
    %c0_43 = arith.constant 0 : index
    %159 = vector.load %arg11[%158, %c0_43] : memref<64x128xf32, #tpu.memory_space<vmem>>, vector<8x128xf32>
    %cst_44 = arith.constant dense<0.000000e+00> : vector<8x128xf32>
    %160 = tpu.matmul %153, %7, %cst_44 {dimension_numbers = #tpu.dot_dimension_numbers<[1], [0], [0], [1], [0, 0, 1, 1], [], []>} : vector<8x32xf32>, vector<32x128xf32>, vector<8x128xf32> -> vector<8x128xf32>
    %161 = arith.addf %159, %160 : vector<8x128xf32>
    %162 = arith.addf %161, %161 : vector<8x128xf32>
    %163 = arith.select %13, %162, %161 : vector<8x128xi1>, vector<8x128xf32>
    %164 = arith.negf %163 : vector<8x128xf32>
    %165 = math.exp %164 : vector<8x128xf32>
    %cst_45 = arith.constant 1.000000e+00 : f32
    %166 = vector.broadcast %cst_45 : f32 to vector<8x128xf32>
    %167 = arith.addf %166, %165 : vector<8x128xf32>
    %168 = arith.divf %166, %167 : vector<8x128xf32>
    %169 = arith.addf %168, %168 : vector<8x128xf32>
    %cst_46 = arith.constant 1.000000e+00 : f32
    %170 = vector.broadcast %cst_46 : f32 to vector<8x128xf32>
    %171 = arith.subf %169, %170 : vector<8x128xf32>
    %172 = arith.select %13, %171, %168 : vector<8x128xi1>, vector<8x128xf32>
    %173 = vector.extract_strided_slice %172 {offsets = [0, 0], sizes = [8, 32], strides = [1, 1]} : vector<8x128xf32> to vector<8x32xf32>
    %174 = vector.extract_strided_slice %172 {offsets = [0, 32], sizes = [8, 32], strides = [1, 1]} : vector<8x128xf32> to vector<8x32xf32>
    %175 = vector.extract_strided_slice %172 {offsets = [0, 64], sizes = [8, 32], strides = [1, 1]} : vector<8x128xf32> to vector<8x32xf32>
    %176 = vector.extract_strided_slice %172 {offsets = [0, 96], sizes = [8, 32], strides = [1, 1]} : vector<8x128xf32> to vector<8x32xf32>
    %177 = arith.mulf %174, %151 : vector<8x32xf32>
    %178 = arith.mulf %173, %175 : vector<8x32xf32>
    %179 = arith.addf %177, %178 : vector<8x32xf32>
    %180 = math.tanh %179 : vector<8x32xf32>
    %181 = arith.mulf %176, %180 : vector<8x32xf32>
    %182 = arith.index_cast %157 : i32 to index
    %c0_47 = arith.constant 0 : index
    %183 = vector.load %arg12[%182, %c0_47] : memref<64x32xf32, #tpu.memory_space<vmem>>, vector<8x32xf32>
    tpu.vector_store %arg12[%182, %c0_47], %181 {strides = array<i32>} : memref<64x32xf32, #tpu.memory_space<vmem>>, vector<8x32xf32>,
    %c6_i32 = arith.constant 6 : i32
    %c8_i32_48 = arith.constant 8 : i32
    %184 = arith.muli %c6_i32, %c8_i32_48 : i32
    %185 = tpu.assume_multiple %184, 8 : i32
    %186 = arith.index_cast %185 : i32 to index
    %c0_49 = arith.constant 0 : index
    %187 = vector.load %arg11[%186, %c0_49] : memref<64x128xf32, #tpu.memory_space<vmem>>, vector<8x128xf32>
    %cst_50 = arith.constant dense<0.000000e+00> : vector<8x128xf32>
    %188 = tpu.matmul %181, %7, %cst_50 {dimension_numbers = #tpu.dot_dimension_numbers<[1], [0], [0], [1], [0, 0, 1, 1], [], []>} : vector<8x32xf32>, vector<32x128xf32>, vector<8x128xf32> -> vector<8x128xf32>
    %189 = arith.addf %187, %188 : vector<8x128xf32>
    %190 = arith.addf %189, %189 : vector<8x128xf32>
    %191 = arith.select %13, %190, %189 : vector<8x128xi1>, vector<8x128xf32>
    %192 = arith.negf %191 : vector<8x128xf32>
    %193 = math.exp %192 : vector<8x128xf32>
    %cst_51 = arith.constant 1.000000e+00 : f32
    %194 = vector.broadcast %cst_51 : f32 to vector<8x128xf32>
    %195 = arith.addf %194, %193 : vector<8x128xf32>
    %196 = arith.divf %194, %195 : vector<8x128xf32>
    %197 = arith.addf %196, %196 : vector<8x128xf32>
    %cst_52 = arith.constant 1.000000e+00 : f32
    %198 = vector.broadcast %cst_52 : f32 to vector<8x128xf32>
    %199 = arith.subf %197, %198 : vector<8x128xf32>
    %200 = arith.select %13, %199, %196 : vector<8x128xi1>, vector<8x128xf32>
    %201 = vector.extract_strided_slice %200 {offsets = [0, 0], sizes = [8, 32], strides = [1, 1]} : vector<8x128xf32> to vector<8x32xf32>
    %202 = vector.extract_strided_slice %200 {offsets = [0, 32], sizes = [8, 32], strides = [1, 1]} : vector<8x128xf32> to vector<8x32xf32>
    %203 = vector.extract_strided_slice %200 {offsets = [0, 64], sizes = [8, 32], strides = [1, 1]} : vector<8x128xf32> to vector<8x32xf32>
    %204 = vector.extract_strided_slice %200 {offsets = [0, 96], sizes = [8, 32], strides = [1, 1]} : vector<8x128xf32> to vector<8x32xf32>
    %205 = arith.mulf %202, %179 : vector<8x32xf32>
    %206 = arith.mulf %201, %203 : vector<8x32xf32>
    %207 = arith.addf %205, %206 : vector<8x32xf32>
    %208 = math.tanh %207 : vector<8x32xf32>
    %209 = arith.mulf %204, %208 : vector<8x32xf32>
    %210 = arith.index_cast %185 : i32 to index
    %c0_53 = arith.constant 0 : index
    %211 = vector.load %arg12[%210, %c0_53] : memref<64x32xf32, #tpu.memory_space<vmem>>, vector<8x32xf32>
    tpu.vector_store %arg12[%210, %c0_53], %209 {strides = array<i32>} : memref<64x32xf32, #tpu.memory_space<vmem>>, vector<8x32xf32>,
    %c7_i32 = arith.constant 7 : i32
    %c8_i32_54 = arith.constant 8 : i32
    %212 = arith.muli %c7_i32, %c8_i32_54 : i32
    %213 = tpu.assume_multiple %212, 8 : i32
    %214 = arith.index_cast %213 : i32 to index
    %c0_55 = arith.constant 0 : index
    %215 = vector.load %arg11[%214, %c0_55] : memref<64x128xf32, #tpu.memory_space<vmem>>, vector<8x128xf32>
    %cst_56 = arith.constant dense<0.000000e+00> : vector<8x128xf32>
    %216 = tpu.matmul %209, %7, %cst_56 {dimension_numbers = #tpu.dot_dimension_numbers<[1], [0], [0], [1], [0, 0, 1, 1], [], []>} : vector<8x32xf32>, vector<32x128xf32>, vector<8x128xf32> -> vector<8x128xf32>
    %217 = arith.addf %215, %216 : vector<8x128xf32>
    %218 = arith.addf %217, %217 : vector<8x128xf32>
    %219 = arith.select %13, %218, %217 : vector<8x128xi1>, vector<8x128xf32>
    %220 = arith.negf %219 : vector<8x128xf32>
    %221 = math.exp %220 : vector<8x128xf32>
    %cst_57 = arith.constant 1.000000e+00 : f32
    %222 = vector.broadcast %cst_57 : f32 to vector<8x128xf32>
    %223 = arith.addf %222, %221 : vector<8x128xf32>
    %224 = arith.divf %222, %223 : vector<8x128xf32>
    %225 = arith.addf %224, %224 : vector<8x128xf32>
    %cst_58 = arith.constant 1.000000e+00 : f32
    %226 = vector.broadcast %cst_58 : f32 to vector<8x128xf32>
    %227 = arith.subf %225, %226 : vector<8x128xf32>
    %228 = arith.select %13, %227, %224 : vector<8x128xi1>, vector<8x128xf32>
    %229 = vector.extract_strided_slice %228 {offsets = [0, 0], sizes = [8, 32], strides = [1, 1]} : vector<8x128xf32> to vector<8x32xf32>
    %230 = vector.extract_strided_slice %228 {offsets = [0, 32], sizes = [8, 32], strides = [1, 1]} : vector<8x128xf32> to vector<8x32xf32>
    %231 = vector.extract_strided_slice %228 {offsets = [0, 64], sizes = [8, 32], strides = [1, 1]} : vector<8x128xf32> to vector<8x32xf32>
    %232 = vector.extract_strided_slice %228 {offsets = [0, 96], sizes = [8, 32], strides = [1, 1]} : vector<8x128xf32> to vector<8x32xf32>
    %233 = arith.mulf %230, %207 : vector<8x32xf32>
    %234 = arith.mulf %229, %231 : vector<8x32xf32>
    %235 = arith.addf %233, %234 : vector<8x32xf32>
    %236 = math.tanh %235 : vector<8x32xf32>
    %237 = arith.mulf %232, %236 : vector<8x32xf32>
    %238 = arith.index_cast %213 : i32 to index
    %c0_59 = arith.constant 0 : index
    %239 = vector.load %arg12[%238, %c0_59] : memref<64x32xf32, #tpu.memory_space<vmem>>, vector<8x32xf32>
    tpu.vector_store %arg12[%238, %c0_59], %237 {strides = array<i32>} : memref<64x32xf32, #tpu.memory_space<vmem>>, vector<8x32xf32>,
    %c8_i32_60 = arith.constant 8 : i32
    %c0_61 = arith.constant 0 : index
    %c0_62 = arith.constant 0 : index
    %240 = vector.load %arg12[%c0_61, %c0_62] : memref<64x32xf32, #tpu.memory_space<vmem>>, vector<64x32xf32>
    %c0_63 = arith.constant 0 : index
    %c0_64 = arith.constant 0 : index
    %241 = vector.load %arg4[%c0_63, %c0_64] : memref<32x128xf32, #tpu.memory_space<vmem>>, vector<32x128xf32>
    %cst_65 = arith.constant dense<0.000000e+00> : vector<64x128xf32>
    %242 = tpu.matmul %240, %241, %cst_65 {dimension_numbers = #tpu.dot_dimension_numbers<[1], [0], [0], [1], [0, 0, 1, 1], [], []>} : vector<64x32xf32>, vector<32x128xf32>, vector<64x128xf32> -> vector<64x128xf32>
    %c0_66 = arith.constant 0 : index
    %c0_67 = arith.constant 0 : index
    %243 = vector.load %arg5[%c0_66, %c0_67] : memref<1x128xf32, #tpu.memory_space<vmem>>, vector<1x128xf32>
    %244 = vector.broadcast %243 : vector<1x128xf32> to vector<64x128xf32>
    %245 = arith.addf %242, %244 : vector<64x128xf32>
    %c0_68 = arith.constant 0 : index
    %c0_69 = arith.constant 0 : index
    %246 = vector.load %arg8[%c0_68, %c0_69] : memref<64x128xf32, #tpu.memory_space<vmem>>, vector<64x128xf32>
    tpu.vector_store %arg8[%c0_68, %c0_69], %245 {strides = array<i32>} : memref<64x128xf32, #tpu.memory_space<vmem>>, vector<64x128xf32>,
    %c0_70 = arith.constant 0 : index
    %c0_71 = arith.constant 0 : index
    %247 = vector.load %arg9[%c0_70, %c0_71] : memref<8x32xf32, #tpu.memory_space<vmem>>, vector<8x32xf32>
    tpu.vector_store %arg9[%c0_70, %c0_71], %237 {strides = array<i32>} : memref<8x32xf32, #tpu.memory_space<vmem>>, vector<8x32xf32>,
    %c0_72 = arith.constant 0 : index
    %c0_73 = arith.constant 0 : index
    %248 = vector.load %arg10[%c0_72, %c0_73] : memref<8x32xf32, #tpu.memory_space<vmem>>, vector<8x32xf32>
    tpu.vector_store %arg10[%c0_72, %c0_73], %235 {strides = array<i32>} : memref<8x32xf32, #tpu.memory_space<vmem>>, vector<8x32xf32>,
    return
  }
}

</mosaic_0001>

<bundles_post_ra>
// kernel: lstmnet_forward.1
= control target key start
LH: loop header
LB: loop body
LE: loop exit
PB: predicated region body
PF: predicated region fallthrough
CT: control target
= control target key end

     0   :  { %vm74_vm0 = vcmask 1043456   ;;  %vm49_vm1 = vcmask 293888   ;;  %vm139_vm2 = vcmask 261120   ;;  %v131_v14 = vlaneseq  ;;  %s929_s20 = smov 32   ;;  %s930_s28 = smov 96   ;;  %s1268_s1 = inlined_call_operand.vmem [shape: f32[36,128], index: 1, kind: input, shape index: {}]   ;;  %s1269_s2 = inlined_call_operand.vmem [shape: f32[32,128], index: 2, kind: input, shape index: {}]   ;;  %s1270_s3 = inlined_call_operand.vmem [shape: f32[1,128], index: 3, kind: input, shape index: {}]   ;;  %s1271_s0 = inlined_call_operand.vmem [shape: f32[64,36], index: 0, kind: input, shape index: {}]   ;;  %s1272_s6 = inlined_call_operand.vmem [shape: f32[8,32], index: 6, kind: input, shape index: {}]   ;;  %s1273_s7 = inlined_call_operand.vmem [shape: f32[8,32], index: 7, kind: input, shape index: {}]   ;;  %s1274_s4 = inlined_call_operand.vmem [shape: f32[32,128], index: 4, kind: input, shape index: {}]   ;;  %s1275_s5 = inlined_call_operand.vmem [shape: f32[1,128], index: 5, kind: input, shape index: {}]   ;;  %s1276_s8 = inlined_call_operand.vmem [shape: f32[64,128], index: 8, kind: output, shape index: {0}]   ;;  %s1277_s10 = inlined_call_operand.vmem [shape: f32[8,32], index: 10, kind: output, shape index: {2}]   ;;  %s1278_s9 = inlined_call_operand.vmem [shape: f32[8,32], index: 9, kind: output, shape index: {1}]  }
   0x1   :  { %v44_v0 = vld [vmem:[%s1268_s1 + $0x20] sm:$0xf]  ;;  %v43_v1 = vld [vmem:[%s1268_s1 + $0x18] sm:$0xff]  ;;  %v42_v2 = vld [vmem:[%s1268_s1 + $0x10] sm:$0xff] }
   0x2   :  { %866 = vmatpush.msk.msra.mxu2 %vm74_vm0, %v44_v0  ;;  %825 = vmatpush.msk.msra.mxu0 %vm74_vm0, %v44_v0  ;;  %v998_v3 = vld [vmem:[%s1269_s2 + $0x18] sm:$0xff]  ;;  %v41_v4 = vld [vmem:[%s1268_s1 + $0x8] sm:$0xff]  ;;  %v1008_v5 = vld [vmem:[%s1269_s2 + $0x10] sm:$0xff]  ;;  %v132_v18 = vand.u32 127, %v131_v14 }
   0x3   :  { %302 = vmatpush.msra.mxu3 %v998_v3  ;;  %374 = vmatpush.msra.mxu1 %v998_v3  ;;  %v40_v6 = vld [vmem:[%s1268_s1] sm:$0xff]  ;;  %v38_v7 = vld [vmem:[%s1271_s0 + $0x30] sm:$0xff]  ;;  %v1021_v8 = vld [vmem:[%s1269_s2 + $0x8] sm:$0xff] }
   0x4   :  { %867 = vmatpush.msra.mxu2 %v43_v1  ;;  %90 = vmatpush.msra.mxu0 %v43_v1  ;;  %v32_v9 = vld [vmem:[%s1271_s0] sm:$0xff]  ;;  %v39_v11 = vld [vmem:[%s1271_s0 + $0x38] sm:$0xff]  ;;  %vm133_vm3 = vcmp.ge.s32.totalorder %v132_v18, 64  ;;  %vm134_vm4 = vcmp.lt.s32.totalorder %v132_v18, 96  ;;  %v33_v51 = vld [vmem:[%s1271_s0 + $0x8] sm:$0xff] }
   0x5   :  { %303 = vmatpush.msra.mxu3 %v1008_v5  ;;  %375 = vmatpush.msra.mxu1 %v1008_v5  ;;  %v1032_v10 = vld [vmem:[%s1269_s2] sm:$0xff]  ;;  %vm1075_vm5 = vmand %vm133_vm3, %vm134_vm4 }
   0x6   :  { %868 = vmatpush.msra.mxu2 %v42_v2  ;;  %91 = vmatpush.msra.mxu0 %v42_v2  ;;  %v136_v12 = vld [vmem:[%s1272_s6] sm:$0xff] }
   0x7   :  { %304 = vmatpush.msra.mxu3 %v1021_v8  ;;  %376 = vmatpush.msra.mxu1 %v1021_v8  ;;  %v1072_v17 = vld [vmem:[%s1270_s3] ss:$0 sm:$0xff]  ;;  %s928_s3 = smov 64  }
   0x8   :  { %869 = vmatpush.msra.mxu2 %v41_v4  ;;  %92 = vmatpush.msra.mxu0 %v41_v4  ;;  %v137_v41 = vld [vmem:[%s1273_s7] sm:$0xff] }
   0x9   :  { %305 = vmatpush.msra.mxu3 %v1032_v10  ;;  %377 = vmatpush.msra.mxu1 %v1032_v10 }
   0xa   :  { %870 = vmatpush.msra.mxu2 %v40_v6  ;;  %93 = vmatpush.msra.mxu0 %v40_v6 }
   0xb   :  { %832 = vmatmul.msk.f32.vlgmr.msra.gmra.mxu2 %vm49_vm1, %v38_v7  ;;  %826 = vmatmul.msk.f32.vlgmr.msra.gmra.mxu0 %vm49_vm1, %v32_v9 }
   0xc   :  { %155 = vmatpush.msrb.mxu2 %v998_v3  ;;  %518 = vmatpush.msrb.mxu3 %v998_v3 }
   0xd   :  { %590 = vmatpush.msrb.mxu1 %v998_v3 }
   0xe   :  { %156 = vmatpush.msrb.mxu2 %v1008_v5  ;;  %519 = vmatpush.msrb.mxu3 %v1008_v5 }
   0xf   :  { %591 = vmatpush.msrb.mxu1 %v1008_v5 }
  0x10   :  { %157 = vmatpush.msrb.mxu2 %v1021_v8  ;;  %520 = vmatpush.msrb.mxu3 %v1021_v8 }
  0x11   :  { %592 = vmatpush.msrb.mxu1 %v1021_v8 }
  0x12   :  { %158 = vmatpush.msrb.mxu2 %v1032_v10  ;;  %521 = vmatpush.msrb.mxu3 %v1032_v10 }
  0x13   :  { %833 = vmatmul.msk.f32.gmra.mxu2 %vm49_vm1, %v39_v11  ;;  %593 = vmatpush.msrb.mxu1 %v1032_v10 }
  0x14   :  { %230 = vmatpush.msra.mxu2 %v998_v3  ;;  %827 = vmatmul.msk.f32.gmra.mxu0 %vm49_vm1, %v33_v51 }
  0x16   :  { %231 = vmatpush.msra.mxu2 %v1008_v5 }
  0x18   :  { %232 = vmatpush.msra.mxu2 %v1021_v8 }
  0x1a   :  { %233 = vmatpush.msra.mxu2 %v1032_v10 }
  0x1b   :  { %834 = vmatmul.msk.f32.vlgmr.msrb.gmra.mxu2 %vm139_vm2, %v136_v12 }
  0x1c   :  { %446 = vmatpush.msrb.mxu2 %v998_v3 }
  0x1e   :  { %447 = vmatpush.msrb.mxu2 %v1008_v5 }
  0x20   :  { %448 = vmatpush.msrb.mxu2 %v1021_v8 }
  0x22   :  { %449 = vmatpush.msrb.mxu2 %v1032_v10 }
  0x88   :  { %v95_v16 = vpop.f32.mrf.mxu0 }
  0x89   :  { %v96_v19 = vadd.f32 %v1072_v17, %v95_v16 }
  0x8e   :  { %v1065_v13 = vpop.f32.mrf.mxu2 }
  0x91   :  { %v98_v53 = vpop.f32.mrf.mxu0 }
  0x92   :  { %v99_v54 = vadd.f32 %v1072_v17, %v98_v53  ;;  %v35_v53 = vld [vmem:[%s1271_s0 + $0x18] sm:$0xff] }
  0x96   :  { %v1067_v15 = vpop.f32.mrf.mxu2 }
  0x9e   :  { %v160_v20 = vpop.f32.mrf.mxu2 }
  0x9f   :  { %v163_v21 = vadd.f32 %v160_v20, %v96_v19 }
  0xa1   :  { %v164_v23 = vadd.f32 %v163_v21, %v163_v21 }
  0xa3   :  { %v165_v24 = vsel %vm1075_vm5, %v164_v23, %v163_v21  ;;  %v34_v23 = vld [vmem:[%s1271_s0 + $0x10] sm:$0xff] }
  0xa4   :  { %v835_v25 = vmul.f32 -1.442695, %v165_v24  ;;  %828 = vmatmul.msk.f32.gmra.mxu0 %vm49_vm1, %v34_v23 }
  0xa6   :  { %880 = vpow2.f32 %v835_v25 }
  0xac   :  { %v881_v26 = vpop.eup %880  ;;  %829 = vmatmul.msk.f32.gmra.mxu0 %vm49_vm1, %v35_v53 }
  0xad   :  { %v169_v27 = vadd.f32 1.0, %v881_v26 }
  0xaf   :  { %882 = vrcp.f32 %v169_v27  ;;  %v181_v31 = vand.u32 2147483648, %v169_v27  ;;  %v179_v33 = vand.u32 2147483647, %v169_v27  ;;  %vm175_vm7 = vweird.f32 %v169_v27 }
  0xb1   :  { %v182_v35 = vor.u32 1.1754944e-38, %v181_v31  ;;  %vm180_vm9 = vcmp.eq.f32.partialorder %v179_v33, 8.507059e+37 }
  0xb5   :  { %v883_v28 = vpop.eup %882 }
  0xb6   :  { %v171_v29 = vmul.f32 %v883_v28, %v169_v27  ;;  %vm176_vm6 = vweird.f32 %v883_v28 }
  0xb7   :  { %vm177_vm8 = vmor %vm175_vm7, %vm176_vm6 }
  0xb8   :  { %v172_v30 = vsub.f32 1.0, %v171_v29 }
  0xba   :  { %v173_v32 = vmul.f32 %v883_v28, %v172_v30 }
  0xbc   :  { %v174_v34 = vadd.f32 %v883_v28, %v173_v32 }
  0xbe   :  { %v178_v36 = vsel %vm177_vm8, %v883_v28, %v174_v34 }
  0xbf   :  { %v183_v37 = vsel %vm180_vm9, %v182_v35, %v178_v36 }
  0xc0   :  { %v185_v38 = vadd.f32 %v183_v37, %v183_v37 }
  0xc2   :  { %v836_v39 = vadd.f32 -1.0, %v185_v38 }
  0xc4   :  { %v187_v40 = vsel %vm1075_vm5, %v836_v39, %v183_v37 }
  0xc5   :  { %194 = vrot.lane.b32.xlu0 %v187_v40, %s928_s3 }
  0xcd   :  { %189 = vrot.lane.b32.xlu0 %v137_v41, %s929_s20 }
 0x121   :  { %v101_v25 = vpop.f32.mrf.mxu0 }
 0x122   :  { %v102_v26 = vadd.f32 %v1072_v17, %v101_v25 }
 0x137   :  { %v195_v42 = vpop.permute.xlu0 %194 }
 0x138   :  { %v197_v43 = vmul.f32 %v195_v42, %v187_v40 }
 0x13a   :  { %199 = vrot.lane.b32.xlu1 %v197_v43, %s929_s20 }
 0x13f   :  { %v190_v44 = vpop.permute.xlu0 %189 }
 0x140   :  { %v192_v45 = vmul.f32 %v190_v44, %v187_v40 }
 0x1ac   :  { %v200_v46 = vpop.permute.xlu1 %199 }
 0x1ad   :  { %v202_v47 = vadd.f32 %v200_v46, %v192_v45 }
 0x1af   :  { %884 = vtanh.f32 %v202_v47 }
 0x1b5   :  { %v885_v48 = vpop.eup %884 }
 0x1b6   :  { %205 = vrot.lane.b32.xlu1 %v885_v48, %s928_s3 }
 0x228   :  { %v206_v49 = vpop.permute.xlu1 %205 }
 0x229   :  { %v208_v50 = vmul.f32 %v206_v49, %v187_v40 }
 0x22b   :  { %210 = vrot.lane.b32.xlu2 %v208_v50, %s929_s20 }
 0x285   :  { %v211_v52 = vpop.permute.xlu2 %210 }
 0x286   :  { %213 = vst.msk [vmem:[#allocation3] sm:$0xff] %vm139_vm2, %v211_v52  ;;  %837 = vmatmul.msk.f32.vlgmr.msra.gmra.mxu2 %vm139_vm2, %v211_v52 }
 0x287   :  { %662 = vmatpush.msra.mxu2 %v998_v3 }
 0x289   :  { %663 = vmatpush.msra.mxu2 %v1008_v5 }
 0x28b   :  { %664 = vmatpush.msra.mxu2 %v1021_v8 }
 0x28d   :  { %665 = vmatpush.msra.mxu2 %v1032_v10 }
 0x309   :  { %v235_v55 = vpop.f32.mrf.mxu2 }
 0x30a   :  { %v238_v56 = vadd.f32 %v235_v55, %v99_v54 }
 0x30c   :  { %v239_v57 = vadd.f32 %v238_v56, %v238_v56 }
 0x30e   :  { %v240_v58 = vsel %vm1075_vm5, %v239_v57, %v238_v56  ;;  %v104_v57 = vpop.f32.mrf.mxu0 }
 0x30f   :  { %v838_v59 = vmul.f32 -1.442695, %v240_v58  ;;  %v105_v58 = vadd.f32 %v1072_v17, %v104_v57 }
 0x311   :  { %886 = vpow2.f32 %v838_v59 }
 0x317   :  { %v887_v60 = vpop.eup %886 }
 0x318   :  { %v244_v61 = vadd.f32 1.0, %v887_v60 }
 0x31a   :  { %888 = vrcp.f32 %v244_v61  ;;  %v256_v1 = vand.u32 2147483648, %v244_v61  ;;  %v254_v3 = vand.u32 2147483647, %v244_v61  ;;  %vm250_vm11 = vweird.f32 %v244_v61 }
 0x31c   :  { %v257_v5 = vor.u32 1.1754944e-38, %v256_v1  ;;  %vm255_vm13 = vcmp.eq.f32.partialorder %v254_v3, 8.507059e+37 }
 0x320   :  { %v889_v62 = vpop.eup %888 }
 0x321   :  { %v246_v63 = vmul.f32 %v889_v62, %v244_v61  ;;  %vm251_vm10 = vweird.f32 %v889_v62 }
 0x322   :  { %vm252_vm12 = vmor %vm250_vm11, %vm251_vm10 }
 0x323   :  { %v247_v0 = vsub.f32 1.0, %v246_v63 }
 0x325   :  { %v248_v2 = vmul.f32 %v889_v62, %v247_v0 }
 0x327   :  { %v249_v4 = vadd.f32 %v889_v62, %v248_v2 }
 0x329   :  { %v253_v6 = vsel %vm252_vm12, %v889_v62, %v249_v4 }
 0x32a   :  { %v258_v7 = vsel %vm255_vm13, %v257_v5, %v253_v6 }
 0x32b   :  { %v260_v8 = vadd.f32 %v258_v7, %v258_v7 }
 0x32d   :  { %v839_v9 = vadd.f32 -1.0, %v260_v8 }
 0x32f   :  { %v262_v10 = vsel %vm1075_vm5, %v839_v9, %v258_v7 }
 0x330   :  { %265 = vrot.lane.b32.xlu2 %v262_v10, %s928_s3  ;;  %v263_v14 = vmul.f32 %v262_v10, %v202_v47 }
 0x38a   :  { %v266_v11 = vpop.permute.xlu2 %265 }
 0x38b   :  { %v268_v12 = vmul.f32 %v266_v11, %v262_v10 }
 0x38d   :  { %270 = vrot.lane.b32.xlu0 %v268_v12, %s929_s20 }
 0x3ff   :  { %v271_v16 = vpop.permute.xlu0 %270 }
 0x400   :  { %v273_v18 = vadd.f32 %v271_v16, %v263_v14 }
 0x402   :  { %890 = vtanh.f32 %v273_v18 }
 0x408   :  { %v891_v19 = vpop.eup %890 }
 0x409   :  { %276 = vrot.lane.b32.xlu1 %v891_v19, %s928_s3 }
 0x47b   :  { %v277_v20 = vpop.permute.xlu1 %276 }
 0x47c   :  { %v279_v21 = vmul.f32 %v277_v20, %v262_v10 }
 0x47e   :  { %281 = vrot.lane.b32.xlu2 %v279_v21, %s929_s20 }
 0x4d8   :  { %v282_v24 = vpop.permute.xlu2 %281 }
 0x4d9   :  { %285 = vst.msk [vmem:[#allocation3 + $0x8] sm:$0xff] %vm139_vm2, %v282_v24  ;;  %840 = vmatmul.msk.f32.vlgmr.msra.gmra.mxu3 %vm139_vm2, %v282_v24 }
 0x55c   :  { %v307_v27 = vpop.f32.mrf.mxu3 }
 0x55d   :  { %v310_v28 = vadd.f32 %v307_v27, %v102_v26  ;;  %v36_v27 = vld [vmem:[%s1271_s0 + $0x20] sm:$0xff] }
 0x55e   :  { %830 = vmatmul.msk.f32.gmra.mxu0 %vm49_vm1, %v36_v27 }
 0x55f   :  { %v311_v29 = vadd.f32 %v310_v28, %v310_v28 }
 0x561   :  { %v312_v30 = vsel %vm1075_vm5, %v311_v29, %v310_v28 }
 0x562   :  { %v841_v31 = vmul.f32 -1.442695, %v312_v30 }
 0x564   :  { %892 = vpow2.f32 %v841_v31 }
 0x56a   :  { %v893_v32 = vpop.eup %892 }
 0x56b   :  { %v316_v33 = vadd.f32 1.0, %v893_v32 }
 0x56d   :  { %894 = vrcp.f32 %v316_v33  ;;  %v328_v37 = vand.u32 2147483648, %v316_v33  ;;  %v326_v39 = vand.u32 2147483647, %v316_v33  ;;  %vm322_vm15 = vweird.f32 %v316_v33 }
 0x56f   :  { %v329_v41 = vor.u32 1.1754944e-38, %v328_v37  ;;  %vm327_vm3 = vcmp.eq.f32.partialorder %v326_v39, 8.507059e+37 }
 0x573   :  { %v895_v34 = vpop.eup %894 }
 0x574   :  { %v318_v35 = vmul.f32 %v895_v34, %v316_v33  ;;  %vm323_vm14 = vweird.f32 %v895_v34 }
 0x575   :  { %vm324_vm0 = vmor %vm322_vm15, %vm323_vm14 }
 0x576   :  { %v319_v36 = vsub.f32 1.0, %v318_v35 }
 0x578   :  { %v320_v38 = vmul.f32 %v895_v34, %v319_v36 }
 0x57a   :  { %v321_v40 = vadd.f32 %v895_v34, %v320_v38 }
 0x57c   :  { %v325_v42 = vsel %vm324_vm0, %v895_v34, %v321_v40 }
 0x57d   :  { %v330_v43 = vsel %vm327_vm3, %v329_v41, %v325_v42 }
 0x57e   :  { %v332_v44 = vadd.f32 %v330_v43, %v330_v43 }
 0x580   :  { %v842_v45 = vadd.f32 -1.0, %v332_v44 }
 0x582   :  { %v334_v46 = vsel %vm1075_vm5, %v842_v45, %v330_v43 }
 0x583   :  { %337 = vrot.lane.b32.xlu0 %v334_v46, %s928_s3  ;;  %v335_v49 = vmul.f32 %v334_v46, %v273_v18 }
 0x5db   :  { %v107_v29 = vpop.f32.mrf.mxu0 }
 0x5dc   :  { %v108_v30 = vadd.f32 %v1072_v17, %v107_v29 }
 0x5f5   :  { %v338_v47 = vpop.permute.xlu0 %337 }
 0x5f6   :  { %v340_v48 = vmul.f32 %v338_v47, %v334_v46 }
 0x5f8   :  { %342 = vrot.lane.b32.xlu1 %v340_v48, %s929_s20 }
 0x66a   :  { %v343_v50 = vpop.permute.xlu1 %342 }
 0x66b   :  { %v345_v51 = vadd.f32 %v343_v50, %v335_v49 }
 0x66d   :  { %896 = vtanh.f32 %v345_v51 }
 0x673   :  { %v897_v52 = vpop.eup %896 }
 0x674   :  { %348 = vrot.lane.b32.xlu2 %v897_v52, %s928_s3 }
 0x6ce   :  { %v349_v54 = vpop.permute.xlu2 %348 }
 0x6cf   :  { %v351_v55 = vmul.f32 %v349_v54, %v334_v46 }
 0x6d1   :  { %353 = vrot.lane.b32.xlu0 %v351_v55, %s929_s20 }
 0x743   :  { %v354_v56 = vpop.permute.xlu0 %353 }
 0x744   :  { %357 = vst.msk [vmem:[#allocation3 + $0x10] sm:$0xff] %vm139_vm2, %v354_v56  ;;  %843 = vmatmul.msk.f32.vlgmr.msra.gmra.mxu1 %vm139_vm2, %v354_v56 }
 0x7c1   :  { %v379_v59 = vpop.f32.mrf.mxu1 }
 0x7c2   :  { %v382_v60 = vadd.f32 %v379_v59, %v105_v58  ;;  %v729_v59 = vld [vmem:[%s1274_s4 + $0x18] sm:$0xff] }
 0x7c3   :  { %871 = vmatpush.msra.mxu3 %v729_v59  ;;  %770 = vmatpush.msra.mxu1 %v729_v59 }
 0x7c4   :  { %v383_v61 = vadd.f32 %v382_v60, %v382_v60 }
 0x7c6   :  { %v384_v62 = vsel %vm1075_vm5, %v383_v61, %v382_v60  ;;  %v728_v60 = vld [vmem:[%s1274_s4 + $0x10] sm:$0xff]  ;;  %v37_v61 = vld [vmem:[%s1271_s0 + $0x28] sm:$0xff] }
 0x7c7   :  { %v844_v63 = vmul.f32 -1.442695, %v384_v62  ;;  %831 = vmatmul.msk.f32.gmra.mxu0 %vm49_vm1, %v37_v61  ;;  %v727_v62 = vld [vmem:[%s1274_s4 + $0x8] sm:$0xff]  ;;  %872 = vmatpush.msra.mxu3 %v728_v60 }
 0x7c8   :  { %771 = vmatpush.msra.mxu1 %v728_v60 }
 0x7c9   :  { %898 = vpow2.f32 %v844_v63  ;;  %v726_v63 = vld [vmem:[%s1274_s4] sm:$0xff]  ;;  %873 = vmatpush.msra.mxu3 %v727_v62 }
 0x7ca   :  { %772 = vmatpush.msra.mxu1 %v727_v62 }
 0x7cb   :  { %874 = vmatpush.msra.mxu3 %v726_v63 }
 0x7cc   :  { %773 = vmatpush.msra.mxu1 %v726_v63 }
 0x7cf   :  { %v899_v0 = vpop.eup %898 }
 0x7d0   :  { %v388_v1 = vadd.f32 1.0, %v899_v0 }
 0x7d2   :  { %900 = vrcp.f32 %v388_v1  ;;  %v400_v5 = vand.u32 2147483648, %v388_v1  ;;  %v398_v7 = vand.u32 2147483647, %v388_v1  ;;  %vm394_vm6 = vweird.f32 %v388_v1 }
 0x7d4   :  { %v401_v9 = vor.u32 1.1754944e-38, %v400_v5  ;;  %vm399_vm8 = vcmp.eq.f32.partialorder %v398_v7, 8.507059e+37 }
 0x7d8   :  { %v901_v2 = vpop.eup %900 }
 0x7d9   :  { %v390_v3 = vmul.f32 %v901_v2, %v388_v1  ;;  %vm395_vm4 = vweird.f32 %v901_v2 }
 0x7da   :  { %vm396_vm7 = vmor %vm394_vm6, %vm395_vm4 }
 0x7db   :  { %v391_v4 = vsub.f32 1.0, %v390_v3 }
 0x7dd   :  { %v392_v6 = vmul.f32 %v901_v2, %v391_v4 }
 0x7df   :  { %v393_v8 = vadd.f32 %v901_v2, %v392_v6 }
 0x7e1   :  { %v397_v10 = vsel %vm396_vm7, %v901_v2, %v393_v8  ;;  %v1183_v8 = vld [vmem:[%s1275_s5] ss:$0 sm:$0xff] }
 0x7e2   :  { %v402_v11 = vsel %vm399_vm8, %v401_v9, %v397_v10 }
 0x7e3   :  { %v404_v12 = vadd.f32 %v402_v11, %v402_v11 }
 0x7e5   :  { %v845_v14 = vadd.f32 -1.0, %v404_v12 }
 0x7e7   :  { %v406_v16 = vsel %vm1075_vm5, %v845_v14, %v402_v11 }
 0x7e8   :  { %409 = vrot.lane.b32.xlu1 %v406_v16, %s928_s3  ;;  %v407_v20 = vmul.f32 %v406_v16, %v345_v51 }
 0x844   :  { %v110_v2 = vpop.f32.mrf.mxu0 }
 0x845   :  { %v111_v3 = vadd.f32 %v1072_v17, %v110_v2 }
 0x85a   :  { %v410_v18 = vpop.permute.xlu1 %409 }
 0x85b   :  { %v412_v19 = vmul.f32 %v410_v18, %v406_v16 }
 0x85d   :  { %414 = vrot.lane.b32.xlu2 %v412_v19, %s929_s20 }
 0x8b7   :  { %v415_v21 = vpop.permute.xlu2 %414 }
 0x8b8   :  { %v417_v23 = vadd.f32 %v415_v21, %v407_v20 }
 0x8ba   :  { %902 = vtanh.f32 %v417_v23 }
 0x8c0   :  { %v903_v24 = vpop.eup %902 }
 0x8c1   :  { %420 = vrot.lane.b32.xlu0 %v903_v24, %s928_s3 }
 0x933   :  { %v421_v25 = vpop.permute.xlu0 %420 }
 0x934   :  { %v423_v26 = vmul.f32 %v421_v25, %v406_v16 }
 0x936   :  { %425 = vrot.lane.b32.xlu1 %v423_v26, %s929_s20 }
 0x9a8   :  { %v426_v28 = vpop.permute.xlu1 %425 }
 0x9a9   :  { %429 = vst.msk [vmem:[#allocation3 + $0x18] sm:$0xff] %vm139_vm2, %v426_v28  ;;  %846 = vmatmul.msk.f32.vlgmr.msrb.gmra.mxu2 %vm139_vm2, %v426_v28 }
 0xa2c   :  { %v451_v31 = vpop.f32.mrf.mxu2 }
 0xa2d   :  { %v454_v32 = vadd.f32 %v451_v31, %v108_v30 }
 0xa2f   :  { %v455_v33 = vadd.f32 %v454_v32, %v454_v32 }
 0xa31   :  { %v456_v34 = vsel %vm1075_vm5, %v455_v33, %v454_v32 }
 0xa32   :  { %v847_v35 = vmul.f32 -1.442695, %v456_v34 }
 0xa34   :  { %904 = vpow2.f32 %v847_v35 }
 0xa3a   :  { %v905_v36 = vpop.eup %904 }
 0xa3b   :  { %v460_v37 = vadd.f32 1.0, %v905_v36 }
 0xa3d   :  { %906 = vrcp.f32 %v460_v37  ;;  %v472_v41 = vand.u32 2147483648, %v460_v37  ;;  %v470_v43 = vand.u32 2147483647, %v460_v37  ;;  %vm466_vm10 = vweird.f32 %v460_v37 }
 0xa3f   :  { %v473_v45 = vor.u32 1.1754944e-38, %v472_v41  ;;  %vm471_vm12 = vcmp.eq.f32.partialorder %v470_v43, 8.507059e+37  ;;  %v720_v43 = vld [vmem:[#allocation3 + $0x10] sm:$0xff] }
 0xa43   :  { %v907_v38 = vpop.eup %906 }
 0xa44   :  { %v462_v39 = vmul.f32 %v907_v38, %v460_v37  ;;  %vm467_vm9 = vweird.f32 %v907_v38 }
 0xa45   :  { %vm468_vm11 = vmor %vm466_vm10, %vm467_vm9 }
 0xa46   :  { %v463_v40 = vsub.f32 1.0, %v462_v39 }
 0xa48   :  { %v464_v42 = vmul.f32 %v907_v38, %v463_v40  ;;  %v718_v40 = vld [vmem:[#allocation3] sm:$0xff] }
 0xa4a   :  { %v465_v44 = vadd.f32 %v907_v38, %v464_v42  ;;  %v719_v42 = vld [vmem:[#allocation3 + $0x8] sm:$0xff] }
 0xa4c   :  { %v469_v46 = vsel %vm468_vm11, %v907_v38, %v465_v44  ;;  %v721_v44 = vld [vmem:[#allocation3 + $0x18] sm:$0xff] }
 0xa4d   :  { %v474_v47 = vsel %vm471_vm12, %v473_v45, %v469_v46  ;;  %v114_v45 = vadd.f32 %v1072_v17, %v1065_v13 }
 0xa4e   :  { %v476_v48 = vadd.f32 %v474_v47, %v474_v47 }
 0xa50   :  { %v848_v49 = vadd.f32 -1.0, %v476_v48 }
 0xa52   :  { %v478_v50 = vsel %vm1075_vm5, %v848_v49, %v474_v47 }
 0xa53   :  { %481 = vrot.lane.b32.xlu2 %v478_v50, %s928_s3  ;;  %v479_v53 = vmul.f32 %v478_v50, %v417_v23 }
 0xaad   :  { %v482_v51 = vpop.permute.xlu2 %481 }
 0xaae   :  { %v484_v52 = vmul.f32 %v482_v51, %v478_v50 }
 0xab0   :  { %486 = vrot.lane.b32.xlu0 %v484_v52, %s929_s20 }
 0xb22   :  { %v487_v54 = vpop.permute.xlu0 %486 }
 0xb23   :  { %v1153_v55 = vadd.f32 %v487_v54, %v479_v53 }
 0xb25   :  { %908 = vtanh.f32 %v1153_v55 }
 0xb2b   :  { %v909_v56 = vpop.eup %908 }
 0xb2c   :  { %492 = vrot.lane.b32.xlu1 %v909_v56, %s928_s3 }
 0xb9e   :  { %v493_v57 = vpop.permute.xlu1 %492 }
 0xb9f   :  { %v495_v58 = vmul.f32 %v493_v57, %v478_v50 }
 0xba1   :  { %497 = vrot.lane.b32.xlu2 %v495_v58, %s929_s20 }
 0xbfb   :  { %v498_v0 = vpop.permute.xlu2 %497 }
 0xbfc   :  { %501 = vst.msk [vmem:[#allocation3 + $0x20] sm:$0xff] %vm139_vm2, %v498_v0  ;;  %849 = vmatmul.msk.f32.vlgmr.msrb.gmra.mxu3 %vm139_vm2, %v498_v0 }
 0xc03   :  { %v722_v1 = vld [vmem:[#allocation3 + $0x20] sm:$0xff] }
 0xc04   :  { %862 = vmatmul.msk.f32.vlgmr.msra.gmra.mxu3 %vm139_vm2, %v722_v1 }
 0xc7f   :  { %v523_v4 = vpop.f32.mrf.mxu3 }
 0xc80   :  { %v526_v5 = vadd.f32 %v523_v4, %v111_v3 }
 0xc82   :  { %v527_v6 = vadd.f32 %v526_v5, %v526_v5 }
 0xc84   :  { %v528_v7 = vsel %vm1075_vm5, %v527_v6, %v526_v5 }
 0xc85   :  { %v850_v9 = vmul.f32 -1.442695, %v528_v7 }
 0xc87   :  { %910 = vpow2.f32 %v850_v9  ;;  %v787_v10 = vpop.f32.mrf.mxu3 }
 0xc88   :  { %v788_v11 = vadd.f32 %v1183_v8, %v787_v10 }
 0xc8a   :  { %803 = vst [vmem:[%s1276_s8 + $0x20] sm:$0xff] %v788_v11 }
 0xc8d   :  { %v911_v12 = vpop.eup %910 }
 0xc8e   :  { %v532_v14 = vadd.f32 1.0, %v911_v12 }
 0xc90   :  { %912 = vrcp.f32 %v532_v14  ;;  %v544_v20 = vand.u32 2147483648, %v532_v14  ;;  %v542_v23 = vand.u32 2147483647, %v532_v14  ;;  %vm538_vm13 = vweird.f32 %v532_v14 }
 0xc92   :  { %v545_v25 = vor.u32 1.1754944e-38, %v544_v20  ;;  %vm543_vm15 = vcmp.eq.f32.partialorder %v542_v23, 8.507059e+37 }
 0xc96   :  { %v913_v16 = vpop.eup %912 }
 0xc97   :  { %v534_v18 = vmul.f32 %v913_v16, %v532_v14  ;;  %vm539_vm1 = vweird.f32 %v913_v16 }
 0xc98   :  { %vm540_vm14 = vmor %vm538_vm13, %vm539_vm1 }
 0xc99   :  { %v535_v19 = vsub.f32 1.0, %v534_v18 }
 0xc9b   :  { %v536_v21 = vmul.f32 %v913_v16, %v535_v19 }
 0xc9d   :  { %v537_v24 = vadd.f32 %v913_v16, %v536_v21 }
 0xc9f   :  { %v541_v26 = vsel %vm540_vm14, %v913_v16, %v537_v24 }
 0xca0   :  { %v546_v27 = vsel %vm543_vm15, %v545_v25, %v541_v26  ;;  %v117_v26 = vadd.f32 %v1072_v17, %v1067_v15 }
 0xca1   :  { %v548_v28 = vadd.f32 %v546_v27, %v546_v27 }
 0xca3   :  { %v851_v29 = vadd.f32 -1.0, %v548_v28 }
 0xca5   :  { %v550_v30 = vsel %vm1075_vm5, %v851_v29, %v546_v27 }
 0xca6   :  { %553 = vrot.lane.b32.xlu0 %v550_v30, %s928_s3  ;;  %v551_v33 = vmul.f32 %v550_v30, %v1153_v55 }
 0xd18   :  { %v554_v31 = vpop.permute.xlu0 %553 }
 0xd19   :  { %v556_v32 = vmul.f32 %v554_v31, %v550_v30 }
 0xd1b   :  { %558 = vrot.lane.b32.xlu1 %v556_v32, %s929_s20 }
 0xd8d   :  { %v559_v34 = vpop.permute.xlu1 %558 }
 0xd8e   :  { %v1194_v35 = vadd.f32 %v559_v34, %v551_v33 }
 0xd90   :  { %914 = vtanh.f32 %v1194_v35 }
 0xd96   :  { %v915_v36 = vpop.eup %914 }
 0xd97   :  { %564 = vrot.lane.b32.xlu2 %v915_v36, %s928_s3 }
 0xdf1   :  { %v565_v37 = vpop.permute.xlu2 %564 }
 0xdf2   :  { %v567_v38 = vmul.f32 %v565_v37, %v550_v30 }
 0xdf4   :  { %569 = vrot.lane.b32.xlu0 %v567_v38, %s929_s20 }
 0xe66   :  { %v570_v39 = vpop.permute.xlu0 %569 }
 0xe67   :  { %573 = vst.msk [vmem:[#allocation3 + $0x28] sm:$0xff] %vm139_vm2, %v570_v39  ;;  %852 = vmatmul.msk.f32.vlgmr.msrb.gmra.mxu1 %vm139_vm2, %v570_v39 }
 0xe6e   :  { %v723_v41 = vld [vmem:[#allocation3 + $0x28] sm:$0xff] }
 0xe6f   :  { %858 = vmatmul.msk.f32.vlgmr.msra.gmra.mxu1 %vm139_vm2, %v718_v40  ;;  %863 = vmatmul.msk.f32.gmra.mxu3 %vm139_vm2, %v723_v41 }
 0xe77   :  { %859 = vmatmul.msk.f32.gmra.mxu1 %vm139_vm2, %v719_v42 }
 0xe7f   :  { %860 = vmatmul.msk.f32.gmra.mxu1 %vm139_vm2, %v720_v43 }
 0xe87   :  { %861 = vmatmul.msk.f32.gmra.mxu1 %vm139_vm2, %v721_v44 }
 0xee4   :  { %v595_v46 = vpop.f32.mrf.mxu1 }
 0xee5   :  { %v598_v47 = vadd.f32 %v595_v46, %v114_v45 }
 0xee7   :  { %v599_v48 = vadd.f32 %v598_v47, %v598_v47 }
 0xee9   :  { %v600_v49 = vsel %vm1075_vm5, %v599_v48, %v598_v47 }
 0xeea   :  { %v853_v50 = vmul.f32 -1.442695, %v600_v49 }
 0xeec   :  { %916 = vpow2.f32 %v853_v50  ;;  %v775_v51 = vpop.f32.mrf.mxu1 }
 0xeed   :  { %v776_v52 = vadd.f32 %v1183_v8, %v775_v51 }
 0xeef   :  { %799 = vst [vmem:[%s1276_s8] sm:$0xff] %v776_v52 }
 0xef2   :  { %v917_v53 = vpop.eup %916  ;;  %v790_v54 = vpop.f32.mrf.mxu3 }
 0xef3   :  { %v604_v55 = vadd.f32 1.0, %v917_v53  ;;  %v791_v13 = vadd.f32 %v1183_v8, %v790_v54 }
 0xef4   :  { %v778_v56 = vpop.f32.mrf.mxu1 }
 0xef5   :  { %918 = vrcp.f32 %v604_v55  ;;  %804 = vst [vmem:[%s1276_s8 + $0x28] sm:$0xff] %v791_v13  ;;  %v779_v57 = vadd.f32 %v1183_v8, %v778_v56  ;;  %v616_v63 = vand.u32 2147483648, %v604_v55  ;;  %v614_v1 = vand.u32 2147483647, %v604_v55 }
 0xef6   :  { %vm610_vm3 = vweird.f32 %v604_v55 }
 0xef7   :  { %800 = vst [vmem:[%s1276_s8 + $0x8] sm:$0xff] %v779_v57  ;;  %v617_v3 = vor.u32 1.1754944e-38, %v616_v63  ;;  %vm615_vm6 = vcmp.eq.f32.partialorder %v614_v1, 8.507059e+37 }
 0xefb   :  { %v919_v58 = vpop.eup %918 }
 0xefc   :  { %v781_v59 = vpop.f32.mrf.mxu1  ;;  %v606_v60 = vmul.f32 %v919_v58, %v604_v55  ;;  %vm611_vm0 = vweird.f32 %v919_v58 }
 0xefd   :  { %v782_v61 = vadd.f32 %v1183_v8, %v781_v59  ;;  %vm612_vm4 = vmor %vm610_vm3, %vm611_vm0 }
 0xefe   :  { %v607_v62 = vsub.f32 1.0, %v606_v60 }
 0xeff   :  { %801 = vst [vmem:[%s1276_s8 + $0x10] sm:$0xff] %v782_v61 }
 0xf00   :  { %v608_v0 = vmul.f32 %v919_v58, %v607_v62 }
 0xf02   :  { %v609_v2 = vadd.f32 %v919_v58, %v608_v0 }
 0xf04   :  { %v784_v4 = vpop.f32.mrf.mxu1  ;;  %v613_v5 = vsel %vm612_vm4, %v919_v58, %v609_v2 }
 0xf05   :  { %v785_v6 = vadd.f32 %v1183_v8, %v784_v4  ;;  %v618_v7 = vsel %vm615_vm6, %v617_v3, %v613_v5 }
 0xf06   :  { %v620_v9 = vadd.f32 %v618_v7, %v618_v7 }
 0xf07   :  { %802 = vst [vmem:[%s1276_s8 + $0x18] sm:$0xff] %v785_v6 }
 0xf08   :  { %v854_v10 = vadd.f32 -1.0, %v620_v9 }
 0xf0a   :  { %v622_v11 = vsel %vm1075_vm5, %v854_v10, %v618_v7 }
 0xf0b   :  { %625 = vrot.lane.b32.xlu1 %v622_v11, %s928_s3  ;;  %v623_v16 = vmul.f32 %v622_v11, %v1194_v35 }
 0xf7d   :  { %v626_v12 = vpop.permute.xlu1 %625 }
 0xf7e   :  { %v628_v14 = vmul.f32 %v626_v12, %v622_v11 }
 0xf80   :  { %630 = vrot.lane.b32.xlu2 %v628_v14, %s929_s20 }
 0xfda   :  { %v631_v18 = vpop.permute.xlu2 %630 }
 0xfdb   :  { %v633_v19 = vadd.f32 %v631_v18, %v623_v16 }
 0xfdd   :  { %920 = vtanh.f32 %v633_v19 }
 0xfe3   :  { %v921_v20 = vpop.eup %920 }
 0xfe4   :  { %636 = vrot.lane.b32.xlu0 %v921_v20, %s928_s3 }
0x1056   :  { %v637_v21 = vpop.permute.xlu0 %636 }
0x1057   :  { %v639_v23 = vmul.f32 %v637_v21, %v622_v11 }
0x1059   :  { %641 = vrot.lane.b32.xlu1 %v639_v23, %s929_s20 }
0x10cb   :  { %v642_v24 = vpop.permute.xlu1 %641 }
0x10cc   :  { %645 = vst.msk [vmem:[#allocation3 + $0x30] sm:$0xff] %vm139_vm2, %v642_v24  ;;  %855 = vmatmul.msk.f32.vlgmr.msra.gmra.mxu2 %vm139_vm2, %v642_v24 }
0x10d3   :  { %v724_v25 = vld [vmem:[#allocation3 + $0x30] sm:$0xff] }
0x10d4   :  { %864 = vmatmul.msk.f32.gmra.mxu3 %vm139_vm2, %v724_v25 }
0x114f   :  { %v667_v27 = vpop.f32.mrf.mxu2 }
0x1150   :  { %v670_v28 = vadd.f32 %v667_v27, %v117_v26 }
0x1152   :  { %v671_v29 = vadd.f32 %v670_v28, %v670_v28 }
0x1154   :  { %v672_v30 = vsel %vm1075_vm5, %v671_v29, %v670_v28 }
0x1155   :  { %v856_v31 = vmul.f32 -1.442695, %v672_v30 }
0x1157   :  { %922 = vpow2.f32 %v856_v31  ;;  %v793_v32 = vpop.f32.mrf.mxu3 }
0x1158   :  { %v794_v33 = vadd.f32 %v1183_v8, %v793_v32 }
0x115a   :  { %805 = vst [vmem:[%s1276_s8 + $0x30] sm:$0xff] %v794_v33 }
0x115d   :  { %v923_v34 = vpop.eup %922 }
0x115e   :  { %v676_v35 = vadd.f32 1.0, %v923_v34 }
0x1160   :  { %924 = vrcp.f32 %v676_v35  ;;  %v688_v37 = vand.u32 2147483648, %v676_v35  ;;  %v686_v39 = vand.u32 2147483647, %v676_v35  ;;  %vm682_vm8 = vweird.f32 %v676_v35 }
0x1162   :  { %v689_v41 = vor.u32 1.1754944e-38, %v688_v37  ;;  %vm687_vm10 = vcmp.eq.f32.partialorder %v686_v39, 8.507059e+37 }
0x1166   :  { %v925_v36 = vpop.eup %924 }
0x1167   :  { %v678_v15 = vmul.f32 %v925_v36, %v676_v35  ;;  %vm683_vm7 = vweird.f32 %v925_v36 }
0x1168   :  { %vm684_vm9 = vmor %vm682_vm8, %vm683_vm7 }
0x1169   :  { %v679_v17 = vsub.f32 1.0, %v678_v15 }
0x116b   :  { %v680_v38 = vmul.f32 %v925_v36, %v679_v17 }
0x116d   :  { %v681_v40 = vadd.f32 %v925_v36, %v680_v38 }
0x116f   :  { %v685_v42 = vsel %vm684_vm9, %v925_v36, %v681_v40 }
0x1170   :  { %v690_v43 = vsel %vm687_vm10, %v689_v41, %v685_v42 }
0x1171   :  { %v692_v44 = vadd.f32 %v690_v43, %v690_v43 }
0x1173   :  { %v857_v45 = vadd.f32 -1.0, %v692_v44 }
0x1175   :  { %v694_v46 = vsel %vm1075_vm5, %v857_v45, %v690_v43 }
0x1176   :  { %697 = vrot.lane.b32.xlu2 %v694_v46, %s928_s3  ;;  %v695_v49 = vmul.f32 %v694_v46, %v633_v19 }
0x11d0   :  { %v698_v47 = vpop.permute.xlu2 %697 }
0x11d1   :  { %v700_v48 = vmul.f32 %v698_v47, %v694_v46 }
0x11d3   :  { %702 = vrot.lane.b32.xlu0 %v700_v48, %s929_s20 }
0x1245   :  { %v703_v50 = vpop.permute.xlu0 %702 }
0x1246   :  { %v705_v51 = vadd.f32 %v703_v50, %v695_v49 }
0x1248   :  { %926 = vtanh.f32 %v705_v51  ;;  %809 = vrot.lane.b32.xlu0 %v705_v51, %s930_s28 }
0x124e   :  { %v927_v52 = vpop.eup %926 }
0x124f   :  { %708 = vrot.lane.b32.xlu1 %v927_v52, %s928_s3 }
0x12ba   :  { %v810_v53 = vpop.permute.xlu0 %809 }
0x12bb   :  { %812 = vst.msk [vmem:[%s1277_s10] sm:$0xff] %vm139_vm2, %v810_v53 }
0x12c1   :  { %v709_v22 = vpop.permute.xlu1 %708 }
0x12c2   :  { %v711_v54 = vmul.f32 %v709_v22, %v694_v46 }
0x12c4   :  { %713 = vrot.lane.b32.xlu2 %v711_v54, %s929_s20 }
0x131e   :  { %v714_v55 = vpop.permute.xlu2 %713 }
0x131f   :  { %717 = vst.msk [vmem:[#allocation3 + $0x38] sm:$0xff] %vm139_vm2, %v714_v55 }
0x1320   :  { %807 = vst.msk [vmem:[%s1278_s9] sm:$0xff] %vm139_vm2, %v714_v55 }
0x1326   :  { %v725_v13 = vld [vmem:[#allocation3 + $0x38] sm:$0xff] }
0x1327   :  { %865 = vmatmul.msk.f32.gmra.mxu3 %vm139_vm2, %v725_v13 }
0x13aa   :  { %v796_v56 = vpop.f32.mrf.mxu3 }
0x13ab   :  { %v797_v57 = vadd.f32 %v1183_v8, %v796_v56 }
0x13ad   :  { %806 = vst [vmem:[%s1276_s8 + $0x38] sm:$0xff] %v797_v57 }

</bundles_post_ra>
